<compile_context>
chip_gen: v6e
topology: v6e:2x2x1
jax: 0.10.0
libtpu: 0.0.40
codegen_flags: <defaults>
</compile_context>

<pallas_src>
import functools
import math

import jax
import jax.numpy as jnp
from jax.experimental import pallas as pl
from jax.experimental.pallas import tpu as pltpu


def _round_up(x, m):
    return ((x + m - 1) // m) * m


# ----------------------------- kernel ----------------------------------------


def _ln_kernel(x_ref, w_ref, *rest, eps, seg_size, num_seg, with_bias):
    """LayerNorm over packed segments of the lane dim of a (tr, L) block.

    L = num_seg * seg_size.  num_seg == 1: plain last-dim stats.  num_seg > 1:
    `num_seg` tokens are packed side-by-side along the 128-wide lane dim; per-token
    stats use segmented masked full-width reductions so every load/store/VALU op
    runs at full lane density (no vst.msk partial stores).
    """
    if with_bias:
        b_ref, o_ref = rest
    else:
        (o_ref,) = rest

    x = x_ref[...].astype(jnp.float32)                        # (tr, L) f32 stats

    if num_seg == 1:
        mu = jnp.mean(x, axis=-1, keepdims=True)
        xc = x - mu
        var = jnp.mean(xc * xc, axis=-1, keepdims=True)
    else:
        lane = jax.lax.broadcasted_iota(jnp.int32, (1, x.shape[-1]), 1)
        inv_c = 1.0 / seg_size                                # power-of-two, exact
        mu = jnp.zeros_like(x)
        for s in range(num_seg):                              # static unroll (small k)
            m = (lane >= s * seg_size) & (lane < (s + 1) * seg_size)
            seg_mean = jnp.sum(jnp.where(m, x, 0.0), axis=-1, keepdims=True) * inv_c
            mu = jnp.where(m, seg_mean, mu)
        xc = x - mu
        sq = xc * xc
        var = jnp.zeros_like(x)
        for s in range(num_seg):
            m = (lane >= s * seg_size) & (lane < (s + 1) * seg_size)
            seg_var = jnp.sum(jnp.where(m, sq, 0.0), axis=-1, keepdims=True) * inv_c
            var = jnp.where(m, seg_var, var)

    inv = jax.lax.rsqrt(var + eps)                            # EUP slot
    num = xc if with_bias else x                              # BiasFree keeps un-centered x
    y = num * inv * w_ref[...].astype(jnp.float32)
    if with_bias:
        y = y + b_ref[...].astype(jnp.float32)
    o_ref[...] = y.astype(o_ref.dtype)


# ----------------------------- wrapper ----------------------------------------


def layer_norm_without_shape(x, weight, bias=None, *, layernorm_type="WithBias",
                             eps=1e-5, target_block_bytes=2 * 1024 * 1024):
    """LayerNorm over the last dim of x (any leading shape), row-tiled Pallas."""
    orig_shape = x.shape
    C = int(orig_shape[-1])
    rows = int(math.prod(orig_shape[:-1])) if len(orig_shape) > 1 else 1
    dtype = x.dtype
    itemsize = jnp.dtype(dtype).itemsize
    with_bias = layernorm_type != "BiasFree"

    x2 = x.reshape(rows, C)                                   # free reshape

    # Lane packing: fold k tokens per 128-wide lane row when C divides 128.
    if C < 128 and 128 % C == 0 and rows % (128 // C) == 0:
        k = 128 // C
    else:
        k = 1                                                 # C = 48/96, etc.: fallback
    L = k * C
    rows_eff = rows // k
    x2 = x2.reshape(rows_eff, L)                              # free, contiguous

    # Row tile sized by bytes (~target f32 working block), sublane-aligned;
    # ragged tail handled by the cdiv grid (no padding, no output slice).
    packing = max(1, 4 // itemsize)
    sub = 8 * packing
    tr = _round_up(max(1, target_block_bytes // (L * 4)), sub)
    tr = min(tr, _round_up(rows_eff, sub))
    if tr >= rows_eff:
        tr = rows_eff                                         # single full block
    grid = (pl.cdiv(rows_eff, tr),)

    w2 = weight.reshape(1, C)
    if k > 1:
        w2 = jnp.tile(w2, (1, k))                             # tiny, one-time
    operands = [x2, w2]
    row_spec = pl.BlockSpec((tr, L), lambda i: (i, 0))
    param_spec = pl.BlockSpec((1, L), lambda i: (0, 0))       # resident params
    in_specs = [row_spec, param_spec]
    if with_bias:
        b2 = bias.reshape(1, C)
        if k > 1:
            b2 = jnp.tile(b2, (1, k))
        operands.append(b2)
        in_specs.append(param_spec)

    kern = functools.partial(_ln_kernel, eps=eps, seg_size=C, num_seg=k,
                             with_bias=with_bias)

    # VMEM budget: double-buffered (in + out) I/O blocks + ~6 f32 temporaries +
    # resident params, with margin; clamp to [32 MiB, 0.75 * per-core capacity].
    io_block = tr * L * itemsize
    f32_block = tr * L * 4
    vmem_needed = 4 * io_block + 6 * f32_block + 4 * L * 4
    try:
        cap = int(pltpu.get_tpu_info().vmem_capacity_bytes)
    except Exception:
        cap = 64 * 1024 * 1024                                # conservative (v7x per-TC)
    vmem_limit = int(min(int(0.75 * cap),
                         max(32 * 1024 * 1024, int(1.5 * vmem_needed))))
    vmem_limit = max(vmem_limit, vmem_needed)

    out = pl.pallas_call(
        kern,
        out_shape=jax.ShapeDtypeStruct((rows_eff, L), dtype),
        grid_spec=pltpu.PrefetchScalarGridSpec(
            num_scalar_prefetch=0,
            grid=grid,
            in_specs=in_specs,
            out_specs=pl.BlockSpec((tr, L), lambda i: (i, 0)),
        ),
        compiler_params=pltpu.CompilerParams(
            dimension_semantics=("parallel",),
            vmem_limit_bytes=vmem_limit,
        ),
    )(*operands)

    return out.reshape(orig_shape)


# ----------------------------- reference & test -------------------------------


def _reference(x, weight, bias=None, *, layernorm_type="WithBias", eps=1e-5):
    xf = x.astype(jnp.float32)
    mu = jnp.mean(xf, axis=-1, keepdims=True)
    var = jnp.mean((xf - mu) ** 2, axis=-1, keepdims=True)
    w = weight.astype(jnp.float32)
    if layernorm_type == "BiasFree":
        y = xf / jnp.sqrt(var + eps) * w
    else:
        y = (xf - mu) / jnp.sqrt(var + eps) * w + bias.astype(jnp.float32)
    return y.astype(x.dtype)


if __name__ == "__main__":
    key = jax.random.PRNGKey(0)
    ks = jax.random.split(key, 12)

    # Case 1: WithBias, HI-Diff token layout (B, H*W, C) with C=48 (no 128-packing),
    # small block target -> multi-step grid with a ragged tail block (no padding).
    x1 = jax.random.normal(ks[0], (2, 16 * 16, 48), jnp.float32)
    w1 = 1.0 + 0.1 * jax.random.normal(ks[1], (48,), jnp.float32)
    b1 = 0.1 * jax.random.normal(ks[2], (48,), jnp.float32)
    out1 = jax.block_until_ready(
        layer_norm_without_shape(x1, w1, b1, layernorm_type="WithBias",
                                 target_block_bytes=64 * 1024))
    ref1 = _reference(x1, w1, b1, layernorm_type="WithBias")
    assert out1.shape == x1.shape
    assert jnp.allclose(out1, ref1, atol=1e-4, rtol=1e-4), "WithBias C=48 mismatch"

    # Case 2: BiasFree, C=64 -> lane-packed path (k=2, 128-wide rows), multi-block.
    x2 = jax.random.normal(ks[3], (2, 128, 64), jnp.float32)
    w2 = 1.0 + 0.1 * jax.random.normal(ks[4], (64,), jnp.float32)
    out2 = jax.block_until_ready(
        layer_norm_without_shape(x2, w2, layernorm_type="BiasFree",
                                 target_block_bytes=32 * 1024))
    ref2 = _reference(x2, w2, layernorm_type="BiasFree")
    assert jnp.allclose(out2, ref2, atol=1e-4, rtol=1e-4), "BiasFree C=64 mismatch"

    # Case 3: WithBias, bf16 I/O (f32 stats in-kernel), C=32 -> packed path (k=4),
    # odd packed-row count handled as a single full block.
    x3 = jax.random.normal(ks[5], (2, 38, 32), jnp.float32).astype(jnp.bfloat16)
    w3 = 1.0 + 0.1 * jax.random.normal(ks[6], (32,), jnp.float32)
    b3 = 0.1 * jax.random.normal(ks[7], (32,), jnp.float32)
    out3 = jax.block_until_ready(
        layer_norm_without_shape(x3, w3, b3, layernorm_type="WithBias"))
    ref3 = _reference(x3, w3, b3, layernorm_type="WithBias")
    assert out3.dtype == jnp.bfloat16
    assert jnp.allclose(out3.astype(jnp.float32), ref3.astype(jnp.float32),
                        atol=3e-2, rtol=3e-2), "bf16 WithBias C=32 mismatch"

    # Case 4: WithBias, tiny ragged row count with C=96 (fallback path, full block).
    x4 = jax.random.normal(ks[8], (1, 7, 96), jnp.float32)
    w4 = 1.0 + 0.1 * jax.random.normal(ks[9], (96,), jnp.float32)
    b4 = 0.1 * jax.random.normal(ks[10], (96,), jnp.float32)
    out4 = jax.block_until_ready(
        layer_norm_without_shape(x4, w4, b4, layernorm_type="WithBias"))
    ref4 = _reference(x4, w4, b4, layernorm_type="WithBias")
    assert jnp.allclose(out4, ref4, atol=1e-4, rtol=1e-4), "WithBias C=96 mismatch"

    print("KERNEL_OK")
</pallas_src>

<mosaic_0001>
module attributes {stable_mosaic.version = 11 : i64} {
  func.func @_ln_kernel(%arg0: i32, %arg1: memref<344x48xf32, #tpu.memory_space<vmem>>, %arg2: memref<1x48xf32, #tpu.memory_space<vmem>>, %arg3: memref<1x48xf32, #tpu.memory_space<vmem>>, %arg4: memref<344x48xf32, #tpu.memory_space<vmem>>) attributes {dimension_semantics = [#tpu.dimension_semantics<parallel>], iteration_bounds = array<i64: 2>, scalar_prefetch = 0 : i64, scratch_operands = 0 : i64, tpu.core_type = #tpu.core_type<tc>, window_params = [{transform_indices = @transform_0, window_bounds = array<i64: 344, 48>}, {pipeline_mode = #tpu.pipeline_mode<synchronous>, transform_indices = @transform_1, window_bounds = array<i64: 1, 48>}, {pipeline_mode = #tpu.pipeline_mode<synchronous>, transform_indices = @transform_2, window_bounds = array<i64: 1, 48>}, {transform_indices = @transform_3, window_bounds = array<i64: 344, 48>}]} {
    %c0 = arith.constant 0 : index
    %c0_0 = arith.constant 0 : index
    %0 = vector.load %arg1[%c0, %c0_0] : memref<344x48xf32, #tpu.memory_space<vmem>>, vector<344x48xf32>
    %cst = arith.constant dense<0.000000e+00> : vector<344xf32>
    %1 = vector.multi_reduction <add>, %0, %cst [1] : vector<344x48xf32> to vector<344xf32>
    %2 = vector.shape_cast %1 : vector<344xf32> to vector<344x1xf32>
    %cst_1 = arith.constant 4.800000e+01 : f32
    %3 = vector.broadcast %cst_1 : f32 to vector<344x1xf32>
    %4 = arith.divf %2, %3 : vector<344x1xf32>
    %5 = vector.broadcast %4 : vector<344x1xf32> to vector<344x48xf32>
    %6 = arith.subf %0, %5 : vector<344x48xf32>
    %7 = arith.mulf %6, %6 : vector<344x48xf32>
    %cst_2 = arith.constant dense<0.000000e+00> : vector<344xf32>
    %8 = vector.multi_reduction <add>, %7, %cst_2 [1] : vector<344x48xf32> to vector<344xf32>
    %9 = vector.shape_cast %8 : vector<344xf32> to vector<344x1xf32>
    %cst_3 = arith.constant 4.800000e+01 : f32
    %10 = vector.broadcast %cst_3 : f32 to vector<344x1xf32>
    %11 = arith.divf %9, %10 : vector<344x1xf32>
    %cst_4 = arith.constant 9.99999974E-6 : f32
    %12 = vector.broadcast %cst_4 : f32 to vector<344x1xf32>
    %13 = arith.addf %11, %12 : vector<344x1xf32>
    %14 = math.rsqrt %13 : vector<344x1xf32>
    %15 = vector.broadcast %14 : vector<344x1xf32> to vector<344x48xf32>
    %16 = arith.mulf %6, %15 : vector<344x48xf32>
    %c0_5 = arith.constant 0 : index
    %c0_6 = arith.constant 0 : index
    %17 = vector.load %arg2[%c0_5, %c0_6] : memref<1x48xf32, #tpu.memory_space<vmem>>, vector<1x48xf32>
    %18 = vector.broadcast %17 : vector<1x48xf32> to vector<344x48xf32>
    %19 = arith.mulf %16, %18 : vector<344x48xf32>
    %c0_7 = arith.constant 0 : index
    %c0_8 = arith.constant 0 : index
    %20 = vector.load %arg3[%c0_7, %c0_8] : memref<1x48xf32, #tpu.memory_space<vmem>>, vector<1x48xf32>
    %21 = vector.broadcast %20 : vector<1x48xf32> to vector<344x48xf32>
    %22 = arith.addf %19, %21 : vector<344x48xf32>
    %c0_9 = arith.constant 0 : index
    %c0_10 = arith.constant 0 : index
    %23 = vector.load %arg4[%c0_9, %c0_10] : memref<344x48xf32, #tpu.memory_space<vmem>>, vector<344x48xf32>
    tpu.vector_store %arg4[%c0_9, %c0_10], %22 {strides = array<i32>} : memref<344x48xf32, #tpu.memory_space<vmem>>, vector<344x48xf32>,
    return
  }
  func.func @transform_0(%arg0: i32) -> (i32, i32) {
    %c0_i32 = arith.constant 0 : i32
    %c0_i32_0 = arith.constant 0 : i32
    return %arg0, %c0_i32 : i32, i32
  }
  func.func @transform_1(%arg0: i32) -> (i32, i32) {
    %c0_i32 = arith.constant 0 : i32
    %c0_i32_0 = arith.constant 0 : i32
    %c0_i32_1 = arith.constant 0 : i32
    return %c0_i32, %c0_i32_0 : i32, i32
  }
  func.func @transform_2(%arg0: i32) -> (i32, i32) {
    %c0_i32 = arith.constant 0 : i32
    %c0_i32_0 = arith.constant 0 : i32
    %c0_i32_1 = arith.constant 0 : i32
    return %c0_i32, %c0_i32_0 : i32, i32
  }
  func.func @transform_3(%arg0: i32) -> (i32, i32) {
    %c0_i32 = arith.constant 0 : i32
    %c0_i32_0 = arith.constant 0 : i32
    return %arg0, %c0_i32 : i32, i32
  }
}

</mosaic_0001>

<bundles_post_ra>
// kernel: tpu_custom_call.1
= control target key start
LH: loop header
LB: loop body
LE: loop exit
PB: predicated region body
PF: predicated region fallthrough
CT: control target
= control target key end

     0   :  { %s1633_s12 = smov 0   ;;  %s1635_s13 = smov 0   ;;  %s2532_s0 = inlined_call_operand.vmem [shape: f32[512,48], index: 0, kind: input, shape index: {}]   ;;  %s2533_s1 = inlined_call_operand.vmem [shape: f32[1,48], index: 1, kind: input, shape index: {}]   ;;  %s2534_s2 = inlined_call_operand.vmem [shape: f32[1,48], index: 2, kind: input, shape index: {}]   ;;  %s2535_s3 = inlined_call_operand.vmem [shape: f32[512,48], index: 3, kind: output, shape index: {}]  }
   0x1   :  { %s1637_s14 = smov 0  }
   0x2 LB: > { %s1646_s15 = sadd.s32 4294967295, %s1579_s14   ;;  %s1648_s16 = sadd.s32 1, %s1579_s14   ;;  %s1579_s14 = sphi %s1637_s14, %s2544_s14   ;;  %s1575_s13 = sphi %s1635_s13, %s2543_s13   ;;  %s1571_s12 = sphi %s1633_s12, %s2542_s12  }
   0x3   : > { %s85_s17 = ssub.s32 %s1579_s14, %s1648_s16  ;;  %s88_s18 = sadd.s32 1, %s1575_s13 }
   0x4   : > { %p86_p0 = scmp.eq.s32.totalorder %s85_s17, 0  ;;  %p98_p1 = scmp.ne.s32.totalorder %s1575_s13, %s1571_s12 }
   0x5   : > { %p99_p2 = scmp.eq.s32.totalorder %s1646_s15, 1  ;;  %p1328_p3 = scmp.ge.s32.totalorder %s1579_s14, 1 }
   0x6   : > { %s1656_s19 = scalar_select %p86_p0, %s1575_s13, %s88_s18  }
   0x7   : > { %p1658_p4 = por %p99_p2, %p98_p1  ;;  %p146_p5 = scmp.lt.s32.totalorder %s1579_s14, 3 }
   0x9   : > { %p147_p6 = pnand %p1328_p3, %p146_p5 }
   0xa   : > { %s1663_s21 = smul.u32 (!%p147_p6), 43, %s1646_s15  ;;  %s170_s27 = sand.u32 (!%p147_p6), 1, %s1571_s12  }
   0xb   : > { %150 = sbr.rel (%p147_p6) target bundleno = 483 (0x1e3), region = 32 }
   0xc   : > { %p178_p7 = scmp.lt.s32.totalorder (!%p147_p6), %s1663_s21, 63  ;;  %s1345_s30 = smul.u32 (!%p147_p6), 344, %s170_s27 }
   0xe   : > { %s2161_s6 = scalar_lea.vmem (!%p147_p6), [#allocation2], %s1345_s30  }
  0x10   : > { %s179_s22 = scalar_select %p178_p7, %s1663_s21, 63  ;;  %vm235_vm0 = vcmask 392192  }
  0x11   : > { %s947_s7 = ssub.s32 (%p1658_p4), 64, %s1663_s21  ;;  %s1344_s8 = smul.u32 (%p1658_p4), 344, %s1646_s15 }
  0x12   : > { %s1329_s23 = sshll.u32 %s179_s22, 3  ;;  %p948_p8 = scmp.lt.s32.totalorder (%p1658_p4), %s947_s7, 43 }
  0x13   : > { %s1670_s26 = scalar_lea.vmem %s2532_s0, %s1329_s23  ;;  %s2380_s11 = scalar_lea.vmem (%p1658_p4), %s2535_s3, %s1344_s8  }
  0x14   : > { %v1673_v0 = vld [vmem:[%s1670_s26] sm:$0xff]  ;;  %v1676_v1 = vld [vmem:[%s1670_s26 + $0x10] sm:$0xff]  ;;  %v1679_v2 = vld [vmem:[%s1670_s26 + $0x8] sm:$0xff] }
  0x15   : > { %v236_v3 = vsel %vm235_vm0, %v1673_v0, 0.0  ;;  %v242_v4 = vsel %vm235_vm0, %v1676_v1, 0.0  ;;  %v1686_v5 = vld [vmem:[%s1670_s26 + $0x18] sm:$0xff]  ;;  %v239_v6 = vsel %vm235_vm0, %v1679_v2, 0.0  ;;  %v1693_v8 = vld [vmem:[%s1670_s26 + $0x20] sm:$0xff]  ;;  %v1696_v9 = vld [vmem:[%s1670_s26 + $0x28] sm:$0xff] }
  0x16   : > { %237 = vadd.xlane.f32.xlu0 %v236_v3  ;;  %243 = vadd.xlane.f32.xlu1 %v242_v4  ;;  %v245_v7 = vsel %vm235_vm0, %v1686_v5, 0.0  ;;  %v248_v10 = vsel %vm235_vm0, %v1693_v8, 0.0  ;;  %v251_v11 = vsel %vm235_vm0, %v1696_v9, 0.0  ;;  %v1703_v12 = vld [vmem:[%s1670_s26 + $0x30] sm:$0xff]  ;;  %v1706_v13 = vld [vmem:[%s1670_s26 + $0x38] sm:$0xff]  ;;  %v1713_v16 = vld [vmem:[%s1670_s26 + $0x40] sm:$0xff] }
  0x17   : > { %v254_v14 = vsel %vm235_vm0, %v1703_v12, 0.0  ;;  %v257_v15 = vsel %vm235_vm0, %v1706_v13, 0.0  ;;  %v1716_v17 = vld [vmem:[%s1670_s26 + $0x48] sm:$0xff]  ;;  %v260_v18 = vsel %vm235_vm0, %v1713_v16, 0.0  ;;  %v1723_v20 = vld [vmem:[%s1670_s26 + $0x50] sm:$0xff]  ;;  %v1726_v21 = vld [vmem:[%s1670_s26 + $0x58] sm:$0xff] }
  0x18   : > { %v263_v19 = vsel %vm235_vm0, %v1716_v17, 0.0  ;;  %v266_v22 = vsel %vm235_vm0, %v1723_v20, 0.0  ;;  %v269_v23 = vsel %vm235_vm0, %v1726_v21, 0.0  ;;  %v1733_v24 = vld [vmem:[%s1670_s26 + $0x60] sm:$0xff]  ;;  %v1736_v25 = vld [vmem:[%s1670_s26 + $0x68] sm:$0xff]  ;;  %v1743_v28 = vld [vmem:[%s1670_s26 + $0x70] sm:$0xff] }
  0x19   : > { %v272_v26 = vsel %vm235_vm0, %v1733_v24, 0.0  ;;  %v275_v27 = vsel %vm235_vm0, %v1736_v25, 0.0  ;;  %v1746_v29 = vld [vmem:[%s1670_s26 + $0x78] sm:$0xff]  ;;  %v278_v30 = vsel %vm235_vm0, %v1743_v28, 0.0  ;;  %v1753_v32 = vld [vmem:[%s1670_s26 + $0x80] sm:$0xff]  ;;  %v1756_v33 = vld [vmem:[%s1670_s26 + $0x88] sm:$0xff] }
  0x1a   : > { %240 = vadd.xlane.f32.xlu0 %v239_v6  ;;  %246 = vadd.xlane.f32.xlu1 %v245_v7  ;;  %v281_v31 = vsel %vm235_vm0, %v1746_v29, 0.0  ;;  %v284_v34 = vsel %vm235_vm0, %v1753_v32, 0.0  ;;  %v287_v35 = vsel %vm235_vm0, %v1756_v33, 0.0  ;;  %v1763_v36 = vld [vmem:[%s1670_s26 + $0x90] sm:$0xff]  ;;  %v1766_v37 = vld [vmem:[%s1670_s26 + $0x98] sm:$0xff]  ;;  %v1773_v40 = vld [vmem:[%s1670_s26 + $0xa0] sm:$0xff] }
  0x1b   : > { %v290_v38 = vsel %vm235_vm0, %v1763_v36, 0.0  ;;  %v293_v39 = vsel %vm235_vm0, %v1766_v37, 0.0  ;;  %v1776_v41 = vld [vmem:[%s1670_s26 + $0xa8] sm:$0xff]  ;;  %v296_v42 = vsel %vm235_vm0, %v1773_v40, 0.0  ;;  %v1783_v44 = vld [vmem:[%s1670_s26 + $0xb0] sm:$0xff]  ;;  %v1786_v45 = vld [vmem:[%s1670_s26 + $0xb8] sm:$0xff] }
  0x1c   : > { %v299_v43 = vsel %vm235_vm0, %v1776_v41, 0.0  ;;  %v302_v46 = vsel %vm235_vm0, %v1783_v44, 0.0  ;;  %v305_v47 = vsel %vm235_vm0, %v1786_v45, 0.0  ;;  %v1793_v48 = vld [vmem:[%s1670_s26 + $0xc0] sm:$0xff]  ;;  %v1796_v49 = vld [vmem:[%s1670_s26 + $0xc8] sm:$0xff]  ;;  %v1803_v52 = vld [vmem:[%s1670_s26 + $0xd0] sm:$0xff] }
  0x1d   : > { %v308_v50 = vsel %vm235_vm0, %v1793_v48, 0.0  ;;  %v311_v51 = vsel %vm235_vm0, %v1796_v49, 0.0  ;;  %v1806_v53 = vld [vmem:[%s1670_s26 + $0xd8] sm:$0xff]  ;;  %v314_v54 = vsel %vm235_vm0, %v1803_v52, 0.0  ;;  %v1813_v56 = vld [vmem:[%s1670_s26 + $0xe0] sm:$0xff]  ;;  %v1816_v57 = vld [vmem:[%s1670_s26 + $0xe8] sm:$0xff] }
  0x1e   : > { %249 = vadd.xlane.f32.xlu0 %v248_v10  ;;  %252 = vadd.xlane.f32.xlu1 %v251_v11  ;;  %v317_v55 = vsel %vm235_vm0, %v1806_v53, 0.0  ;;  %v320_v58 = vsel %vm235_vm0, %v1813_v56, 0.0  ;;  %v323_v59 = vsel %vm235_vm0, %v1816_v57, 0.0  ;;  %v1823_v60 = vld [vmem:[%s1670_s26 + $0xf0] sm:$0xff]  ;;  %v1826_v61 = vld [vmem:[%s1670_s26 + $0xf8] sm:$0xff]  ;;  %v1833_v3 = vld [vmem:[%s1670_s26 + $0x100] sm:$0xff] }
  0x1f   : > { %v326_v62 = vsel %vm235_vm0, %v1823_v60, 0.0  ;;  %v329_v63 = vsel %vm235_vm0, %v1826_v61, 0.0  ;;  %v1836_v4 = vld [vmem:[%s1670_s26 + $0x108] sm:$0xff]  ;;  %v332_v6 = vsel %vm235_vm0, %v1833_v3, 0.0  ;;  %v1843_v10 = vld [vmem:[%s1670_s26 + $0x110] sm:$0xff]  ;;  %v1846_v11 = vld [vmem:[%s1670_s26 + $0x118] sm:$0xff] }
  0x20   : > { %v335_v7 = vsel %vm235_vm0, %v1836_v4, 0.0 }
  0x22   : > { %255 = vadd.xlane.f32.xlu0 %v254_v14  ;;  %258 = vadd.xlane.f32.xlu1 %v257_v15  ;;  %v338_v14 = vsel %vm235_vm0, %v1843_v10, 0.0  ;;  %v341_v15 = vsel %vm235_vm0, %v1846_v11, 0.0 }
  0x26   : > { %261 = vadd.xlane.f32.xlu0 %v260_v18  ;;  %264 = vadd.xlane.f32.xlu1 %v263_v19  ;;  %v1853_v18 = vld [vmem:[%s1670_s26 + $0x120] sm:$0xff]  ;;  %v1856_v19 = vld [vmem:[%s1670_s26 + $0x128] sm:$0xff] }
  0x2a   : > { %267 = vadd.xlane.f32.xlu0 %v266_v22  ;;  %270 = vadd.xlane.f32.xlu1 %v269_v23  ;;  %v344_v22 = vsel %vm235_vm0, %v1853_v18, 0.0  ;;  %v347_v23 = vsel %vm235_vm0, %v1856_v19, 0.0 }
  0x2e   : > { %273 = vadd.xlane.f32.xlu0 %v272_v26  ;;  %276 = vadd.xlane.f32.xlu1 %v275_v27  ;;  %v1863_v26 = vld [vmem:[%s1670_s26 + $0x130] sm:$0xff]  ;;  %v1866_v27 = vld [vmem:[%s1670_s26 + $0x138] sm:$0xff] }
  0x32   : > { %279 = vadd.xlane.f32.xlu0 %v278_v30  ;;  %282 = vadd.xlane.f32.xlu1 %v281_v31  ;;  %v350_v30 = vsel %vm235_vm0, %v1863_v26, 0.0  ;;  %v353_v31 = vsel %vm235_vm0, %v1866_v27, 0.0 }
  0x36   : > { %285 = vadd.xlane.f32.xlu0 %v284_v34  ;;  %288 = vadd.xlane.f32.xlu1 %v287_v35  ;;  %v1873_v34 = vld [vmem:[%s1670_s26 + $0x140] sm:$0xff]  ;;  %v1876_v35 = vld [vmem:[%s1670_s26 + $0x148] sm:$0xff] }
  0x3a   : > { %291 = vadd.xlane.f32.xlu0 %v290_v38  ;;  %294 = vadd.xlane.f32.xlu1 %v293_v39  ;;  %v356_v38 = vsel %vm235_vm0, %v1873_v34, 0.0  ;;  %v359_v39 = vsel %vm235_vm0, %v1876_v35, 0.0 }
  0x3e   : > { %297 = vadd.xlane.f32.xlu0 %v296_v42  ;;  %300 = vadd.xlane.f32.xlu1 %v299_v43  ;;  %v1883_v42 = vld [vmem:[%s1670_s26 + $0x150] sm:$0xff] }
  0x3f   : > { %v362_v43 = vsel %vm235_vm0, %v1883_v42, 0.0 }
  0x42   : > { %303 = vadd.xlane.f32.xlu0 %v302_v46  ;;  %306 = vadd.xlane.f32.xlu1 %v305_v47 }
  0x46   : > { %309 = vadd.xlane.f32.xlu0 %v308_v50  ;;  %312 = vadd.xlane.f32.xlu1 %v311_v51 }
  0x4a   : > { %315 = vadd.xlane.f32.xlu0 %v314_v54  ;;  %318 = vadd.xlane.f32.xlu1 %v317_v55 }
  0x4e   : > { %321 = vadd.xlane.f32.xlu0 %v320_v58  ;;  %324 = vadd.xlane.f32.xlu1 %v323_v59 }
  0x52   : > { %327 = vadd.xlane.f32.xlu0 %v326_v62  ;;  %330 = vadd.xlane.f32.xlu1 %v329_v63 }
  0x56   : > { %333 = vadd.xlane.f32.xlu0 %v332_v6  ;;  %336 = vadd.xlane.f32.xlu1 %v335_v7 }
  0x5a   : > { %339 = vadd.xlane.f32.xlu0 %v338_v14  ;;  %342 = vadd.xlane.f32.xlu1 %v341_v15 }
  0x5e   : > { %345 = vadd.xlane.f32.xlu0 %v344_v22  ;;  %348 = vadd.xlane.f32.xlu1 %v347_v23 }
  0x62   : > { %351 = vadd.xlane.f32.xlu0 %v350_v30  ;;  %354 = vadd.xlane.f32.xlu1 %v353_v31 }
  0x66   : > { %357 = vadd.xlane.f32.xlu0 %v356_v38  ;;  %360 = vadd.xlane.f32.xlu1 %v359_v39 }
  0x6a   : > { %363 = vadd.xlane.f32.xlu0 %v362_v43 }
  0x9f   : > { %v238_v46 = vpop.xlane.xlu0 %237  ;;  %v244_v47 = vpop.xlane.xlu1 %243 }
  0xa0   : > { %v366_v50 = vmul.f32 0.020833334, %v238_v46  ;;  %v368_v51 = vmul.f32 0.020833334, %v244_v47 }
  0xa2   : > { %v1888_v54 = vsub.f32 %v1673_v0, %v366_v50  ;;  %v1891_v55 = vsub.f32 %v1676_v1, %v368_v51 }
  0xa3   : > { %v241_v58 = vpop.xlane.xlu0 %240  ;;  %v247_v59 = vpop.xlane.xlu1 %246 }
  0xa4   : > { %v367_v62 = vmul.f32 0.020833334, %v241_v58  ;;  %v369_v63 = vmul.f32 0.020833334, %v247_v59  ;;  %v452_v6 = vmul.f32 %v1888_v54, %v1888_v54  ;;  %v454_v7 = vmul.f32 %v1891_v55, %v1891_v55 }
  0xa6   : > { %v1898_v14 = vsub.f32 %v1679_v2, %v367_v62  ;;  %v1901_v15 = vsub.f32 %v1686_v5, %v369_v63  ;;  %v495_v0 = vsel %vm235_vm0, %v452_v6, 0.0  ;;  %v501_v23 = vsel %vm235_vm0, %v454_v7, 0.0 }
  0xa7   : > { %496 = vadd.xlane.f32.xlu1 %v495_v0  ;;  %v250_v1 = vpop.xlane.xlu0 %249  ;;  %v253_v22 = vpop.xlane.xlu1 %252 }
  0xa8   : > { %v370_v30 = vmul.f32 0.020833334, %v250_v1  ;;  %v371_v31 = vmul.f32 0.020833334, %v253_v22  ;;  %v453_v38 = vmul.f32 %v1898_v14, %v1898_v14  ;;  %v455_v39 = vmul.f32 %v1901_v15, %v1901_v15 }
  0xaa   : > { %v1910_v2 = vsub.f32 %v1693_v8, %v370_v30  ;;  %v1913_v5 = vsub.f32 %v1696_v9, %v371_v31  ;;  %v498_v43 = vsel %vm235_vm0, %v453_v38, 0.0  ;;  %v504_v50 = vsel %vm235_vm0, %v455_v39, 0.0 }
  0xab   : > { %502 = vadd.xlane.f32.xlu1 %v501_v23  ;;  %499 = vadd.xlane.f32.xlu0 %v498_v43  ;;  %v256_v46 = vpop.xlane.xlu0 %255  ;;  %v259_v47 = vpop.xlane.xlu1 %258 }
  0xac   : > { %v372_v51 = vmul.f32 0.020833334, %v256_v46  ;;  %v373_v58 = vmul.f32 0.020833334, %v259_v47  ;;  %v456_v59 = vmul.f32 %v1910_v2, %v1910_v2  ;;  %v457_v8 = vmul.f32 %v1913_v5, %v1913_v5 }
  0xae   : > { %v1922_v62 = vsub.f32 %v1703_v12, %v372_v51  ;;  %v1925_v9 = vsub.f32 %v1706_v13, %v373_v58  ;;  %v507_v63 = vsel %vm235_vm0, %v456_v59, 0.0  ;;  %v510_v0 = vsel %vm235_vm0, %v457_v8, 0.0 }
  0xaf   : > { %505 = vadd.xlane.f32.xlu0 %v504_v50  ;;  %508 = vadd.xlane.f32.xlu1 %v507_v63  ;;  %v262_v6 = vpop.xlane.xlu0 %261  ;;  %v265_v7 = vpop.xlane.xlu1 %264 }
  0xb0   : > { %v374_v1 = vmul.f32 0.020833334, %v262_v6  ;;  %v375_v22 = vmul.f32 0.020833334, %v265_v7  ;;  %v458_v23 = vmul.f32 %v1922_v62, %v1922_v62  ;;  %v459_v12 = vmul.f32 %v1925_v9, %v1925_v9 }
  0xb2   : > { %v1934_v30 = vsub.f32 %v1713_v16, %v374_v1  ;;  %v1937_v13 = vsub.f32 %v1716_v17, %v375_v22  ;;  %v513_v31 = vsel %vm235_vm0, %v458_v23, 0.0  ;;  %v516_v43 = vsel %vm235_vm0, %v459_v12, 0.0 }
  0xb3   : > { %511 = vadd.xlane.f32.xlu0 %v510_v0  ;;  %514 = vadd.xlane.f32.xlu1 %v513_v31  ;;  %v268_v38 = vpop.xlane.xlu0 %267  ;;  %v271_v39 = vpop.xlane.xlu1 %270 }
  0xb4   : > { %v376_v46 = vmul.f32 0.020833334, %v268_v38  ;;  %v377_v47 = vmul.f32 0.020833334, %v271_v39  ;;  %v460_v50 = vmul.f32 %v1934_v30, %v1934_v30  ;;  %v461_v16 = vmul.f32 %v1937_v13, %v1937_v13 }
  0xb6   : > { %v1946_v51 = vsub.f32 %v1723_v20, %v376_v46  ;;  %v1949_v17 = vsub.f32 %v1726_v21, %v377_v47  ;;  %v519_v58 = vsel %vm235_vm0, %v460_v50, 0.0  ;;  %v522_v63 = vsel %vm235_vm0, %v461_v16, 0.0 }
  0xb7   : > { %517 = vadd.xlane.f32.xlu0 %v516_v43  ;;  %520 = vadd.xlane.f32.xlu1 %v519_v58  ;;  %v274_v59 = vpop.xlane.xlu0 %273  ;;  %v277_v8 = vpop.xlane.xlu1 %276 }
  0xb8   : > { %v378_v6 = vmul.f32 0.020833334, %v274_v59  ;;  %v379_v7 = vmul.f32 0.020833334, %v277_v8  ;;  %v462_v0 = vmul.f32 %v1946_v51, %v1946_v51  ;;  %v463_v20 = vmul.f32 %v1949_v17, %v1949_v17 }
  0xba   : > { %v1958_v1 = vsub.f32 %v1733_v24, %v378_v6  ;;  %v1961_v21 = vsub.f32 %v1736_v25, %v379_v7  ;;  %v525_v22 = vsel %vm235_vm0, %v462_v0, 0.0  ;;  %v528_v31 = vsel %vm235_vm0, %v463_v20, 0.0 }
  0xbb   : > { %523 = vadd.xlane.f32.xlu0 %v522_v63  ;;  %526 = vadd.xlane.f32.xlu1 %v525_v22  ;;  %v280_v23 = vpop.xlane.xlu0 %279  ;;  %v283_v12 = vpop.xlane.xlu1 %282 }
  0xbc   : > { %v380_v38 = vmul.f32 0.020833334, %v280_v23  ;;  %v381_v39 = vmul.f32 0.020833334, %v283_v12  ;;  %v464_v43 = vmul.f32 %v1958_v1, %v1958_v1  ;;  %v465_v24 = vmul.f32 %v1961_v21, %v1961_v21 }
  0xbe   : > { %v1970_v46 = vsub.f32 %v1743_v28, %v380_v38  ;;  %v1973_v25 = vsub.f32 %v1746_v29, %v381_v39  ;;  %v531_v47 = vsel %vm235_vm0, %v464_v43, 0.0  ;;  %v534_v58 = vsel %vm235_vm0, %v465_v24, 0.0 }
  0xbf   : > { %529 = vadd.xlane.f32.xlu0 %v528_v31  ;;  %532 = vadd.xlane.f32.xlu1 %v531_v47  ;;  %v286_v50 = vpop.xlane.xlu0 %285  ;;  %v289_v16 = vpop.xlane.xlu1 %288 }
  0xc0   : > { %v382_v59 = vmul.f32 0.020833334, %v286_v50  ;;  %v383_v8 = vmul.f32 0.020833334, %v289_v16  ;;  %v466_v63 = vmul.f32 %v1970_v46, %v1970_v46  ;;  %v467_v28 = vmul.f32 %v1973_v25, %v1973_v25 }
  0xc2   : > { %v1982_v6 = vsub.f32 %v1753_v32, %v382_v59  ;;  %v1985_v29 = vsub.f32 %v1756_v33, %v383_v8  ;;  %v537_v7 = vsel %vm235_vm0, %v466_v63, 0.0  ;;  %v540_v22 = vsel %vm235_vm0, %v467_v28, 0.0 }
  0xc3   : > { %535 = vadd.xlane.f32.xlu0 %v534_v58  ;;  %538 = vadd.xlane.f32.xlu1 %v537_v7  ;;  %v292_v0 = vpop.xlane.xlu0 %291  ;;  %v295_v20 = vpop.xlane.xlu1 %294 }
  0xc4   : > { %v384_v23 = vmul.f32 0.020833334, %v292_v0  ;;  %v385_v12 = vmul.f32 0.020833334, %v295_v20  ;;  %v468_v31 = vmul.f32 %v1982_v6, %v1982_v6  ;;  %v469_v32 = vmul.f32 %v1985_v29, %v1985_v29 }
  0xc6   : > { %v1994_v38 = vsub.f32 %v1763_v36, %v384_v23  ;;  %v1997_v33 = vsub.f32 %v1766_v37, %v385_v12  ;;  %v543_v39 = vsel %vm235_vm0, %v468_v31, 0.0  ;;  %v546_v47 = vsel %vm235_vm0, %v469_v32, 0.0 }
  0xc7   : > { %541 = vadd.xlane.f32.xlu0 %v540_v22  ;;  %544 = vadd.xlane.f32.xlu1 %v543_v39  ;;  %v298_v43 = vpop.xlane.xlu0 %297  ;;  %v301_v24 = vpop.xlane.xlu1 %300 }
  0xc8   : > { %v386_v50 = vmul.f32 0.020833334, %v298_v43  ;;  %v387_v16 = vmul.f32 0.020833334, %v301_v24  ;;  %v470_v58 = vmul.f32 %v1994_v38, %v1994_v38  ;;  %v471_v36 = vmul.f32 %v1997_v33, %v1997_v33 }
  0xca   : > { %v2006_v59 = vsub.f32 %v1773_v40, %v386_v50  ;;  %v2009_v37 = vsub.f32 %v1776_v41, %v387_v16  ;;  %v549_v8 = vsel %vm235_vm0, %v470_v58, 0.0  ;;  %v552_v7 = vsel %vm235_vm0, %v471_v36, 0.0 }
  0xcb   : > { %547 = vadd.xlane.f32.xlu0 %v546_v47  ;;  %550 = vadd.xlane.f32.xlu1 %v549_v8  ;;  %v304_v63 = vpop.xlane.xlu0 %303  ;;  %v307_v28 = vpop.xlane.xlu1 %306 }
  0xcc   : > { %v388_v0 = vmul.f32 0.020833334, %v304_v63  ;;  %v389_v20 = vmul.f32 0.020833334, %v307_v28  ;;  %v472_v22 = vmul.f32 %v2006_v59, %v2006_v59  ;;  %v473_v40 = vmul.f32 %v2009_v37, %v2009_v37 }
  0xce   : > { %v2018_v23 = vsub.f32 %v1783_v44, %v388_v0  ;;  %v2021_v41 = vsub.f32 %v1786_v45, %v389_v20  ;;  %v555_v12 = vsel %vm235_vm0, %v472_v22, 0.0  ;;  %v558_v39 = vsel %vm235_vm0, %v473_v40, 0.0 }
  0xcf   : > { %553 = vadd.xlane.f32.xlu0 %v552_v7  ;;  %556 = vadd.xlane.f32.xlu1 %v555_v12  ;;  %v310_v31 = vpop.xlane.xlu0 %309  ;;  %v313_v32 = vpop.xlane.xlu1 %312 }
  0xd0   : > { %v390_v43 = vmul.f32 0.020833334, %v310_v31  ;;  %v391_v24 = vmul.f32 0.020833334, %v313_v32  ;;  %v474_v47 = vmul.f32 %v2018_v23, %v2018_v23  ;;  %v475_v44 = vmul.f32 %v2021_v41, %v2021_v41 }
  0xd2   : > { %v2030_v50 = vsub.f32 %v1793_v48, %v390_v43  ;;  %v2033_v45 = vsub.f32 %v1796_v49, %v391_v24  ;;  %v561_v16 = vsel %vm235_vm0, %v474_v47, 0.0  ;;  %v564_v8 = vsel %vm235_vm0, %v475_v44, 0.0 }
  0xd3   : > { %559 = vadd.xlane.f32.xlu0 %v558_v39  ;;  %562 = vadd.xlane.f32.xlu1 %v561_v16  ;;  %v316_v58 = vpop.xlane.xlu0 %315  ;;  %v319_v36 = vpop.xlane.xlu1 %318 }
  0xd4   : > { %v392_v63 = vmul.f32 0.020833334, %v316_v58  ;;  %v393_v28 = vmul.f32 0.020833334, %v319_v36  ;;  %v476_v7 = vmul.f32 %v2030_v50, %v2030_v50  ;;  %v477_v48 = vmul.f32 %v2033_v45, %v2033_v45 }
  0xd6   : > { %v2042_v0 = vsub.f32 %v1803_v52, %v392_v63  ;;  %v2045_v49 = vsub.f32 %v1806_v53, %v393_v28  ;;  %v567_v20 = vsel %vm235_vm0, %v476_v7, 0.0  ;;  %v570_v12 = vsel %vm235_vm0, %v477_v48, 0.0 }
  0xd7   : > { %565 = vadd.xlane.f32.xlu0 %v564_v8  ;;  %568 = vadd.xlane.f32.xlu1 %v567_v20  ;;  %v322_v22 = vpop.xlane.xlu0 %321  ;;  %v325_v40 = vpop.xlane.xlu1 %324 }
  0xd8   : > { %v394_v31 = vmul.f32 0.020833334, %v322_v22  ;;  %v395_v32 = vmul.f32 0.020833334, %v325_v40  ;;  %v478_v39 = vmul.f32 %v2042_v0, %v2042_v0  ;;  %v479_v52 = vmul.f32 %v2045_v49, %v2045_v49 }
  0xda   : > { %v2054_v43 = vsub.f32 %v1813_v56, %v394_v31  ;;  %v2057_v53 = vsub.f32 %v1816_v57, %v395_v32  ;;  %v573_v24 = vsel %vm235_vm0, %v478_v39, 0.0  ;;  %v576_v16 = vsel %vm235_vm0, %v479_v52, 0.0 }
  0xdb   : > { %571 = vadd.xlane.f32.xlu0 %v570_v12  ;;  %574 = vadd.xlane.f32.xlu1 %v573_v24  ;;  %v328_v47 = vpop.xlane.xlu0 %327  ;;  %v331_v44 = vpop.xlane.xlu1 %330 }
  0xdc   : > { %v396_v58 = vmul.f32 0.020833334, %v328_v47  ;;  %v397_v36 = vmul.f32 0.020833334, %v331_v44  ;;  %v480_v8 = vmul.f32 %v2054_v43, %v2054_v43  ;;  %v481_v56 = vmul.f32 %v2057_v53, %v2057_v53 }
  0xde   : > { %v2066_v63 = vsub.f32 %v1823_v60, %v396_v58  ;;  %v2069_v57 = vsub.f32 %v1826_v61, %v397_v36  ;;  %v579_v28 = vsel %vm235_vm0, %v480_v8, 0.0  ;;  %v582_v20 = vsel %vm235_vm0, %v481_v56, 0.0 }
  0xdf   : > { %577 = vadd.xlane.f32.xlu0 %v576_v16  ;;  %580 = vadd.xlane.f32.xlu1 %v579_v28  ;;  %v334_v7 = vpop.xlane.xlu0 %333  ;;  %v337_v48 = vpop.xlane.xlu1 %336 }
  0xe0   : > { %v398_v22 = vmul.f32 0.020833334, %v334_v7  ;;  %v399_v40 = vmul.f32 0.020833334, %v337_v48  ;;  %v482_v12 = vmul.f32 %v2066_v63, %v2066_v63  ;;  %v483_v60 = vmul.f32 %v2069_v57, %v2069_v57 }
  0xe2   : > { %v2078_v31 = vsub.f32 %v1833_v3, %v398_v22  ;;  %v2081_v61 = vsub.f32 %v1836_v4, %v399_v40  ;;  %v585_v32 = vsel %vm235_vm0, %v482_v12, 0.0  ;;  %v588_v24 = vsel %vm235_vm0, %v483_v60, 0.0 }
  0xe3   : > { %583 = vadd.xlane.f32.xlu0 %v582_v20  ;;  %586 = vadd.xlane.f32.xlu1 %v585_v32  ;;  %v340_v39 = vpop.xlane.xlu0 %339  ;;  %v343_v52 = vpop.xlane.xlu1 %342 }
  0xe4   : > { %v400_v47 = vmul.f32 0.020833334, %v340_v39  ;;  %v401_v44 = vmul.f32 0.020833334, %v343_v52  ;;  %v484_v16 = vmul.f32 %v2078_v31, %v2078_v31  ;;  %v485_v3 = vmul.f32 %v2081_v61, %v2081_v61 }
  0xe6   : > { %v2090_v58 = vsub.f32 %v1843_v10, %v400_v47  ;;  %v2093_v4 = vsub.f32 %v1846_v11, %v401_v44  ;;  %v591_v36 = vsel %vm235_vm0, %v484_v16, 0.0  ;;  %v594_v28 = vsel %vm235_vm0, %v485_v3, 0.0 }
  0xe7   : > { %589 = vadd.xlane.f32.xlu0 %v588_v24  ;;  %592 = vadd.xlane.f32.xlu1 %v591_v36  ;;  %v346_v8 = vpop.xlane.xlu0 %345  ;;  %v349_v56 = vpop.xlane.xlu1 %348 }
  0xe8   : > { %v402_v7 = vmul.f32 0.020833334, %v346_v8  ;;  %v403_v48 = vmul.f32 0.020833334, %v349_v56  ;;  %v486_v20 = vmul.f32 %v2090_v58, %v2090_v58  ;;  %v487_v10 = vmul.f32 %v2093_v4, %v2093_v4 }
  0xea   : > { %v2102_v22 = vsub.f32 %v1853_v18, %v402_v7  ;;  %v2105_v11 = vsub.f32 %v1856_v19, %v403_v48  ;;  %v597_v40 = vsel %vm235_vm0, %v486_v20, 0.0  ;;  %v600_v32 = vsel %vm235_vm0, %v487_v10, 0.0 }
  0xeb   : > { %595 = vadd.xlane.f32.xlu0 %v594_v28  ;;  %598 = vadd.xlane.f32.xlu1 %v597_v40  ;;  %v352_v12 = vpop.xlane.xlu0 %351  ;;  %v355_v60 = vpop.xlane.xlu1 %354 }
  0xec   : > { %v404_v39 = vmul.f32 0.020833334, %v352_v12  ;;  %v405_v52 = vmul.f32 0.020833334, %v355_v60  ;;  %v488_v24 = vmul.f32 %v2102_v22, %v2102_v22  ;;  %v489_v18 = vmul.f32 %v2105_v11, %v2105_v11 }
  0xee   : > { %v2114_v47 = vsub.f32 %v1863_v26, %v404_v39  ;;  %v2117_v19 = vsub.f32 %v1866_v27, %v405_v52  ;;  %v603_v44 = vsel %vm235_vm0, %v488_v24, 0.0  ;;  %v606_v36 = vsel %vm235_vm0, %v489_v18, 0.0 }
  0xef   : > { %601 = vadd.xlane.f32.xlu0 %v600_v32  ;;  %604 = vadd.xlane.f32.xlu1 %v603_v44  ;;  %v358_v16 = vpop.xlane.xlu0 %357  ;;  %v361_v3 = vpop.xlane.xlu1 %360 }
  0xf0   : > { %v406_v8 = vmul.f32 0.020833334, %v358_v16  ;;  %v407_v56 = vmul.f32 0.020833334, %v361_v3  ;;  %v490_v28 = vmul.f32 %v2114_v47, %v2114_v47  ;;  %v491_v26 = vmul.f32 %v2117_v19, %v2117_v19 }
  0xf2   : > { %v2126_v7 = vsub.f32 %v1873_v34, %v406_v8  ;;  %v2129_v27 = vsub.f32 %v1876_v35, %v407_v56  ;;  %v609_v48 = vsel %vm235_vm0, %v490_v28, 0.0  ;;  %v612_v40 = vsel %vm235_vm0, %v491_v26, 0.0 }
  0xf3   : > { %607 = vadd.xlane.f32.xlu0 %v606_v36  ;;  %610 = vadd.xlane.f32.xlu1 %v609_v48  ;;  %v364_v20 = vpop.xlane.xlu0 %363 }
  0xf4   : > { %v408_v10 = vmul.f32 0.020833334, %v364_v20  ;;  %v492_v12 = vmul.f32 %v2126_v7, %v2126_v7  ;;  %v493_v60 = vmul.f32 %v2129_v27, %v2129_v27 }
  0xf6   : > { %v2138_v34 = vsub.f32 %v1883_v42, %v408_v10  ;;  %v615_v35 = vsel %vm235_vm0, %v492_v12, 0.0  ;;  %v618_v32 = vsel %vm235_vm0, %v493_v60, 0.0 }
  0xf7   : > { %613 = vadd.xlane.f32.xlu0 %v612_v40  ;;  %616 = vadd.xlane.f32.xlu1 %v615_v35 }
  0xf8   : > { %v494_v39 = vmul.f32 %v2138_v34, %v2138_v34 }
  0xfa   : > { %v621_v52 = vsel %vm235_vm0, %v494_v39, 0.0 }
  0xfb   : > { %619 = vadd.xlane.f32.xlu0 %v618_v32  ;;  %622 = vadd.xlane.f32.xlu1 %v621_v52 }
 0x130   : > { %v497_v24 = vpop.xlane.xlu1 %496 }
 0x131   : > { %v624_v18 = vmul.f32 0.020833334, %v497_v24 }
 0x133   : > { %v667_v44 = vadd.f32 1e-05, %v624_v18 }
 0x134   : > { %v503_v16 = vpop.xlane.xlu1 %502  ;;  %v500_v3 = vpop.xlane.xlu0 %499 }
 0x135   : > { %1435 = vrsqrt.f32 %v667_v44  ;;  %v626_v42 = vmul.f32 0.020833334, %v503_v16  ;;  %v625_v36 = vmul.f32 0.020833334, %v500_v3 }
 0x137   : > { %v669_v8 = vadd.f32 1e-05, %v626_v42  ;;  %v668_v56 = vadd.f32 1e-05, %v625_v36  ;;  %v2149_v42 = vld [vmem:[%s2533_s1] ss:$0 sm:$0xff] }
 0x138   : > { %v509_v28 = vpop.xlane.xlu1 %508  ;;  %v506_v26 = vpop.xlane.xlu0 %505 }
 0x139   : > { %1437 = vrsqrt.f32 %v669_v8  ;;  %v628_v48 = vmul.f32 0.020833334, %v509_v28  ;;  %v627_v20 = vmul.f32 0.020833334, %v506_v26  ;;  %v2155_v28 = vld [vmem:[%s2534_s2] ss:$0 sm:$0xff] }
 0x13a   : > { %1439 = vrsqrt.f32 %v668_v56 }
 0x13b   : > { %v671_v10 = vadd.f32 1e-05, %v628_v48  ;;  %v670_v40 = vadd.f32 1e-05, %v627_v20 }
 0x13c   : > { %v515_v12 = vpop.xlane.xlu1 %514  ;;  %v512_v60 = vpop.xlane.xlu0 %511 }
 0x13d   : > { %1441 = vrsqrt.f32 %v671_v10  ;;  %v630_v35 = vmul.f32 0.020833334, %v515_v12  ;;  %v629_v32 = vmul.f32 0.020833334, %v512_v60 }
 0x13e   : > { %1443 = vrsqrt.f32 %v670_v40 }
 0x13f   : > { %v673_v39 = vadd.f32 1e-05, %v630_v35  ;;  %v672_v52 = vadd.f32 1e-05, %v629_v32 }
 0x140   : > { %v521_v24 = vpop.xlane.xlu1 %520  ;;  %v518_v18 = vpop.xlane.xlu0 %517 }
 0x141   : > { %1445 = vrsqrt.f32 %v673_v39  ;;  %v632_v44 = vmul.f32 0.020833334, %v521_v24  ;;  %v631_v16 = vmul.f32 0.020833334, %v518_v18 }
 0x142   : > { %v1436_v3 = vpop.eup %1435  ;;  %1447 = vrsqrt.f32 %v672_v52 }
 0x143   : > { %v753_v36 = vmul.f32 %v1436_v3, %v1888_v54  ;;  %v675_v8 = vadd.f32 1e-05, %v632_v44  ;;  %v674_v56 = vadd.f32 1e-05, %v631_v16 }
 0x144   : > { %v527_v26 = vpop.xlane.xlu1 %526  ;;  %v524_v48 = vpop.xlane.xlu0 %523 }
 0x145   : > { %v803_v20 = vmul.f32 %v2149_v42, %v753_v36  ;;  %1449 = vrsqrt.f32 %v675_v8  ;;  %v634_v10 = vmul.f32 0.020833334, %v527_v26  ;;  %v633_v40 = vmul.f32 0.020833334, %v524_v48 }
 0x146   : > { %v1438_v12 = vpop.eup %1437  ;;  %1451 = vrsqrt.f32 %v674_v56 }
 0x147   : > { %v1440_v60 = vpop.eup %1439  ;;  %v853_v35 = vadd.f32 %v2155_v28, %v803_v20  ;;  %v755_v54 = vmul.f32 %v1438_v12, %v1891_v55  ;;  %v677_v32 = vadd.f32 1e-05, %v634_v10  ;;  %v676_v39 = vadd.f32 1e-05, %v633_v40 }
 0x148   : > { %v754_v52 = vmul.f32 %v1440_v60, %v1898_v14  ;;  %v533_v24 = vpop.xlane.xlu1 %532  ;;  %v530_v18 = vpop.xlane.xlu0 %529 }
 0x149   : > { %896 = vst.msk [vmem:[%s2161_s6] sm:$0xff] %vm235_vm0, %v853_v35  ;;  %v805_v44 = vmul.f32 %v2149_v42, %v755_v54  ;;  %1453 = vrsqrt.f32 %v677_v32  ;;  %v636_v16 = vmul.f32 0.020833334, %v533_v24  ;;  %v635_v3 = vmul.f32 0.020833334, %v530_v18 }
 0x14a   : > { %v1442_v36 = vpop.eup %1441  ;;  %v804_v55 = vmul.f32 %v2149_v42, %v754_v52  ;;  %1455 = vrsqrt.f32 %v676_v39 }
 0x14b   : > { %v1444_v8 = vpop.eup %1443  ;;  %v855_v14 = vadd.f32 %v2155_v28, %v805_v44  ;;  %v757_v56 = vmul.f32 %v1442_v36, %v1910_v2  ;;  %v679_v26 = vadd.f32 1e-05, %v636_v16  ;;  %v678_v48 = vadd.f32 1e-05, %v635_v3 }
 0x14c   : > { %v854_v20 = vadd.f32 %v2155_v28, %v804_v55  ;;  %v756_v10 = vmul.f32 %v1444_v8, %v1901_v15  ;;  %v539_v40 = vpop.xlane.xlu1 %538  ;;  %v536_v12 = vpop.xlane.xlu0 %535 }
 0x14d   : > { %898 = vst.msk [vmem:[%s2161_s6 + $0x10] sm:$0xff] %vm235_vm0, %v855_v14  ;;  %v807_v60 = vmul.f32 %v2149_v42, %v757_v56  ;;  %1457 = vrsqrt.f32 %v679_v26  ;;  %v638_v35 = vmul.f32 0.020833334, %v539_v40  ;;  %v637_v54 = vmul.f32 0.020833334, %v536_v12 }
 0x14e   : > { %v1446_v32 = vpop.eup %1445  ;;  %897 = vst.msk [vmem:[%s2161_s6 + $0x8] sm:$0xff] %vm235_vm0, %v854_v20  ;;  %v806_v2 = vmul.f32 %v2149_v42, %v756_v10  ;;  %1459 = vrsqrt.f32 %v678_v48 }
 0x14f   : > { %v1448_v39 = vpop.eup %1447  ;;  %v857_v15 = vadd.f32 %v2155_v28, %v807_v60  ;;  %v759_v52 = vmul.f32 %v1446_v32, %v1922_v62  ;;  %v681_v24 = vadd.f32 1e-05, %v638_v35  ;;  %v680_v18 = vadd.f32 1e-05, %v637_v54 }
 0x150   : > { %v856_v44 = vadd.f32 %v2155_v28, %v806_v2  ;;  %v758_v16 = vmul.f32 %v1448_v39, %v1913_v5  ;;  %v545_v3 = vpop.xlane.xlu1 %544  ;;  %v542_v36 = vpop.xlane.xlu0 %541 }
 0x151   : > { %900 = vst.msk [vmem:[%s2161_s6 + $0x20] sm:$0xff] %vm235_vm0, %v857_v15  ;;  %v809_v55 = vmul.f32 %v2149_v42, %v759_v52  ;;  %1461 = vrsqrt.f32 %v681_v24  ;;  %v640_v8 = vmul.f32 0.020833334, %v545_v3  ;;  %v639_v14 = vmul.f32 0.020833334, %v542_v36 }
 0x152   : > { %v1450_v56 = vpop.eup %1449  ;;  %899 = vst.msk [vmem:[%s2161_s6 + $0x18] sm:$0xff] %vm235_vm0, %v856_v44  ;;  %v808_v62 = vmul.f32 %v2149_v42, %v758_v16  ;;  %1463 = vrsqrt.f32 %v680_v18 }
 0x153   : > { %v1452_v26 = vpop.eup %1451  ;;  %v859_v5 = vadd.f32 %v2155_v28, %v809_v55  ;;  %v761_v48 = vmul.f32 %v1450_v56, %v1934_v30  ;;  %v683_v20 = vadd.f32 1e-05, %v640_v8  ;;  %v682_v10 = vadd.f32 1e-05, %v639_v14 }
 0x154   : > { %v858_v40 = vadd.f32 %v2155_v28, %v808_v62  ;;  %v760_v12 = vmul.f32 %v1452_v26, %v1925_v9  ;;  %v551_v60 = vpop.xlane.xlu1 %550  ;;  %v548_v35 = vpop.xlane.xlu0 %547 }
 0x155   : > { %902 = vst.msk [vmem:[%s2161_s6 + $0x30] sm:$0xff] %vm235_vm0, %v859_v5  ;;  %v811_v54 = vmul.f32 %v2149_v42, %v761_v48  ;;  %1465 = vrsqrt.f32 %v683_v20  ;;  %v642_v32 = vmul.f32 0.020833334, %v551_v60  ;;  %v641_v2 = vmul.f32 0.020833334, %v548_v35 }
 0x156   : > { %v1454_v39 = vpop.eup %1453  ;;  %901 = vst.msk [vmem:[%s2161_s6 + $0x28] sm:$0xff] %vm235_vm0, %v858_v40  ;;  %v810_v30 = vmul.f32 %v2149_v42, %v760_v12  ;;  %1467 = vrsqrt.f32 %v682_v10 }
 0x157   : > { %v1456_v15 = vpop.eup %1455  ;;  %v861_v9 = vadd.f32 %v2155_v28, %v811_v54  ;;  %v763_v52 = vmul.f32 %v1454_v39, %v1946_v51  ;;  %v685_v24 = vadd.f32 1e-05, %v642_v32  ;;  %v684_v18 = vadd.f32 1e-05, %v641_v2 }
 0x158   : > { %v860_v44 = vadd.f32 %v2155_v28, %v810_v30  ;;  %v762_v16 = vmul.f32 %v1456_v15, %v1937_v13  ;;  %v557_v3 = vpop.xlane.xlu1 %556  ;;  %v554_v36 = vpop.xlane.xlu0 %553 }
 0x159   : > { %904 = vst.msk [vmem:[%s2161_s6 + $0x40] sm:$0xff] %vm235_vm0, %v861_v9  ;;  %v813_v55 = vmul.f32 %v2149_v42, %v763_v52  ;;  %1469 = vrsqrt.f32 %v685_v24  ;;  %v644_v8 = vmul.f32 0.020833334, %v557_v3  ;;  %v643_v14 = vmul.f32 0.020833334, %v554_v36 }
 0x15a   : > { %v1458_v56 = vpop.eup %1457  ;;  %903 = vst.msk [vmem:[%s2161_s6 + $0x38] sm:$0xff] %vm235_vm0, %v860_v44  ;;  %v812_v51 = vmul.f32 %v2149_v42, %v762_v16  ;;  %1471 = vrsqrt.f32 %v684_v18 }
 0x15b   : > { %v1460_v62 = vpop.eup %1459  ;;  %v863_v13 = vadd.f32 %v2155_v28, %v813_v55  ;;  %v765_v26 = vmul.f32 %v1458_v56, %v1958_v1  ;;  %v687_v5 = vadd.f32 1e-05, %v644_v8  ;;  %v686_v48 = vadd.f32 1e-05, %v643_v14 }
 0x15c   : > { %v862_v20 = vadd.f32 %v2155_v28, %v812_v51  ;;  %v764_v10 = vmul.f32 %v1460_v62, %v1949_v17  ;;  %v563_v40 = vpop.xlane.xlu1 %562  ;;  %v560_v12 = vpop.xlane.xlu0 %559 }
 0x15d   : > { %906 = vst.msk [vmem:[%s2161_s6 + $0x50] sm:$0xff] %vm235_vm0, %v863_v13  ;;  %v815_v60 = vmul.f32 %v2149_v42, %v765_v26  ;;  %1473 = vrsqrt.f32 %v687_v5  ;;  %v646_v35 = vmul.f32 0.020833334, %v563_v40  ;;  %v645_v54 = vmul.f32 0.020833334, %v560_v12 }
 0x15e   : > { %v1462_v32 = vpop.eup %1461  ;;  %905 = vst.msk [vmem:[%s2161_s6 + $0x48] sm:$0xff] %vm235_vm0, %v862_v20  ;;  %v814_v1 = vmul.f32 %v2149_v42, %v764_v10  ;;  %1475 = vrsqrt.f32 %v686_v48 }
 0x15f   : > { %v1464_v2 = vpop.eup %1463  ;;  %v865_v17 = vadd.f32 %v2155_v28, %v815_v60  ;;  %v767_v39 = vmul.f32 %v1462_v32, %v1970_v46  ;;  %v689_v30 = vadd.f32 1e-05, %v646_v35  ;;  %v688_v15 = vadd.f32 1e-05, %v645_v54 }
 0x160   : > { %v864_v9 = vadd.f32 %v2155_v28, %v814_v1  ;;  %v766_v52 = vmul.f32 %v1464_v2, %v1961_v21  ;;  %v569_v24 = vpop.xlane.xlu1 %568  ;;  %v566_v18 = vpop.xlane.xlu0 %565 }
 0x161   : > { %908 = vst.msk [vmem:[%s2161_s6 + $0x60] sm:$0xff] %vm235_vm0, %v865_v17  ;;  %v817_v44 = vmul.f32 %v2149_v42, %v767_v39  ;;  %1477 = vrsqrt.f32 %v689_v30  ;;  %v648_v16 = vmul.f32 0.020833334, %v569_v24  ;;  %v647_v3 = vmul.f32 0.020833334, %v566_v18 }
 0x162   : > { %v1466_v36 = vpop.eup %1465  ;;  %907 = vst.msk [vmem:[%s2161_s6 + $0x58] sm:$0xff] %vm235_vm0, %v864_v9  ;;  %v816_v46 = vmul.f32 %v2149_v42, %v766_v52  ;;  %1479 = vrsqrt.f32 %v688_v15 }
 0x163   : > { %v1468_v55 = vpop.eup %1467  ;;  %v867_v21 = vadd.f32 %v2155_v28, %v817_v44  ;;  %v769_v8 = vmul.f32 %v1466_v36, %v1982_v6  ;;  %v691_v14 = vadd.f32 1e-05, %v648_v16  ;;  %v690_v56 = vadd.f32 1e-05, %v647_v3 }
 0x164   : > { %v866_v51 = vadd.f32 %v2155_v28, %v816_v46  ;;  %v768_v62 = vmul.f32 %v1468_v55, %v1973_v25  ;;  %v575_v13 = vpop.xlane.xlu1 %574  ;;  %v572_v26 = vpop.xlane.xlu0 %571 }
 0x165   : > { %910 = vst.msk [vmem:[%s2161_s6 + $0x70] sm:$0xff] %vm235_vm0, %v867_v21  ;;  %v819_v5 = vmul.f32 %v2149_v42, %v769_v8  ;;  %1481 = vrsqrt.f32 %v691_v14  ;;  %v650_v48 = vmul.f32 0.020833334, %v575_v13  ;;  %v649_v20 = vmul.f32 0.020833334, %v572_v26 }
 0x166   : > { %v1470_v10 = vpop.eup %1469  ;;  %909 = vst.msk [vmem:[%s2161_s6 + $0x68] sm:$0xff] %vm235_vm0, %v866_v51  ;;  %v818_v6 = vmul.f32 %v2149_v42, %v768_v62  ;;  %1483 = vrsqrt.f32 %v690_v56 }
 0x167   : > { %v1472_v40 = vpop.eup %1471  ;;  %v869_v25 = vadd.f32 %v2155_v28, %v819_v5  ;;  %v771_v12 = vmul.f32 %v1470_v10, %v1994_v38  ;;  %v693_v60 = vadd.f32 1e-05, %v650_v48  ;;  %v692_v35 = vadd.f32 1e-05, %v649_v20 }
 0x168   : > { %v868_v54 = vadd.f32 %v2155_v28, %v818_v6  ;;  %v770_v32 = vmul.f32 %v1472_v40, %v1985_v29  ;;  %v581_v1 = vpop.xlane.xlu1 %580  ;;  %v578_v2 = vpop.xlane.xlu0 %577 }
 0x169   : > { %912 = vst.msk [vmem:[%s2161_s6 + $0x80] sm:$0xff] %vm235_vm0, %v869_v25  ;;  %v821_v17 = vmul.f32 %v2149_v42, %v771_v12  ;;  %1485 = vrsqrt.f32 %v693_v60  ;;  %v652_v39 = vmul.f32 0.020833334, %v581_v1  ;;  %v651_v30 = vmul.f32 0.020833334, %v578_v2 }
 0x16a   : > { %v1474_v15 = vpop.eup %1473  ;;  %911 = vst.msk [vmem:[%s2161_s6 + $0x78] sm:$0xff] %vm235_vm0, %v868_v54  ;;  %v820_v38 = vmul.f32 %v2149_v42, %v770_v32  ;;  %1487 = vrsqrt.f32 %v692_v35 }
 0x16b   : > { %v1476_v9 = vpop.eup %1475  ;;  %v871_v29 = vadd.f32 %v2155_v28, %v821_v17  ;;  %v773_v52 = vmul.f32 %v1474_v15, %v2006_v59  ;;  %v695_v24 = vadd.f32 1e-05, %v652_v39  ;;  %v694_v18 = vadd.f32 1e-05, %v651_v30 }
 0x16c   : > { %v870_v44 = vadd.f32 %v2155_v28, %v820_v38  ;;  %v772_v16 = vmul.f32 %v1476_v9, %v1997_v33  ;;  %v587_v3 = vpop.xlane.xlu1 %586  ;;  %v584_v36 = vpop.xlane.xlu0 %583 }
 0x16d   : > { %914 = vst.msk [vmem:[%s2161_s6 + $0x90] sm:$0xff] %vm235_vm0, %v871_v29  ;;  %v823_v46 = vmul.f32 %v2149_v42, %v773_v52  ;;  %1489 = vrsqrt.f32 %v695_v24  ;;  %v654_v55 = vmul.f32 0.020833334, %v587_v3  ;;  %v653_v21 = vmul.f32 0.020833334, %v584_v36 }
 0x16e   : > { %v1478_v8 = vpop.eup %1477  ;;  %913 = vst.msk [vmem:[%s2161_s6 + $0x88] sm:$0xff] %vm235_vm0, %v870_v44  ;;  %v822_v59 = vmul.f32 %v2149_v42, %v772_v16  ;;  %1491 = vrsqrt.f32 %v694_v18 }
 0x16f   : > { %v1480_v14 = vpop.eup %1479  ;;  %v873_v33 = vadd.f32 %v2155_v28, %v823_v46  ;;  %v775_v56 = vmul.f32 %v1478_v8, %v2018_v23  ;;  %v697_v51 = vadd.f32 1e-05, %v654_v55  ;;  %v696_v62 = vadd.f32 1e-05, %v653_v21 }
 0x170   : > { %v872_v13 = vadd.f32 %v2155_v28, %v822_v59  ;;  %v774_v26 = vmul.f32 %v1480_v14, %v2009_v37  ;;  %v593_v5 = vpop.xlane.xlu1 %592  ;;  %v590_v48 = vpop.xlane.xlu0 %589 }
 0x171   : > { %916 = vst.msk [vmem:[%s2161_s6 + $0xa0] sm:$0xff] %vm235_vm0, %v873_v33  ;;  %v825_v20 = vmul.f32 %v2149_v42, %v775_v56  ;;  %1493 = vrsqrt.f32 %v697_v51  ;;  %v656_v10 = vmul.f32 0.020833334, %v593_v5  ;;  %v655_v6 = vmul.f32 0.020833334, %v590_v48 }
 0x172   : > { %v1482_v40 = vpop.eup %1481  ;;  %915 = vst.msk [vmem:[%s2161_s6 + $0x98] sm:$0xff] %vm235_vm0, %v872_v13  ;;  %v824_v23 = vmul.f32 %v2149_v42, %v774_v26  ;;  %1495 = vrsqrt.f32 %v696_v62 }
 0x173   : > { %v1484_v25 = vpop.eup %1483  ;;  %v875_v37 = vadd.f32 %v2155_v28, %v825_v20  ;;  %v777_v12 = vmul.f32 %v1482_v40, %v2030_v50  ;;  %v699_v60 = vadd.f32 1e-05, %v656_v10  ;;  %v698_v35 = vadd.f32 1e-05, %v655_v6 }
 0x174   : > { %v874_v54 = vadd.f32 %v2155_v28, %v824_v23  ;;  %v776_v32 = vmul.f32 %v1484_v25, %v2021_v41  ;;  %v599_v1 = vpop.xlane.xlu1 %598  ;;  %v596_v2 = vpop.xlane.xlu0 %595 }
 0x175   : > { %918 = vst.msk [vmem:[%s2161_s6 + $0xb0] sm:$0xff] %vm235_vm0, %v875_v37  ;;  %v827_v17 = vmul.f32 %v2149_v42, %v777_v12  ;;  %1497 = vrsqrt.f32 %v699_v60  ;;  %v658_v39 = vmul.f32 0.020833334, %v599_v1  ;;  %v657_v30 = vmul.f32 0.020833334, %v596_v2 }
 0x176   : > { %v1486_v15 = vpop.eup %1485  ;;  %917 = vst.msk [vmem:[%s2161_s6 + $0xa8] sm:$0xff] %vm235_vm0, %v874_v54  ;;  %v826_v50 = vmul.f32 %v2149_v42, %v776_v32  ;;  %1499 = vrsqrt.f32 %v698_v35 }
 0x177   : > { %v1488_v38 = vpop.eup %1487  ;;  %v877_v41 = vadd.f32 %v2155_v28, %v827_v17  ;;  %v779_v9 = vmul.f32 %v1486_v15, %v2042_v0  ;;  %v701_v29 = vadd.f32 1e-05, %v658_v39  ;;  %v700_v52 = vadd.f32 1e-05, %v657_v30 }
 0x178   : > { %v876_v24 = vadd.f32 %v2155_v28, %v826_v50  ;;  %v778_v18 = vmul.f32 %v1488_v38, %v2033_v45  ;;  %v605_v44 = vpop.xlane.xlu1 %604  ;;  %v602_v16 = vpop.xlane.xlu0 %601 }
 0x179   : > { %920 = vst.msk [vmem:[%s2161_s6 + $0xc0] sm:$0xff] %vm235_vm0, %v877_v41  ;;  %v829_v3 = vmul.f32 %v2149_v42, %v779_v9  ;;  %1501 = vrsqrt.f32 %v701_v29  ;;  %v660_v36 = vmul.f32 0.020833334, %v605_v44  ;;  %v659_v46 = vmul.f32 0.020833334, %v602_v16 }
 0x17a   : > { %v1490_v55 = vpop.eup %1489  ;;  %919 = vst.msk [vmem:[%s2161_s6 + $0xb8] sm:$0xff] %vm235_vm0, %v876_v24  ;;  %v828_v0 = vmul.f32 %v2149_v42, %v778_v18  ;;  %1503 = vrsqrt.f32 %v700_v52 }
 0x17b   : > { %v1492_v21 = vpop.eup %1491  ;;  %v879_v45 = vadd.f32 %v2155_v28, %v829_v3  ;;  %v781_v8 = vmul.f32 %v1490_v55, %v2054_v43  ;;  %v703_v59 = vadd.f32 1e-05, %v660_v36  ;;  %v702_v14 = vadd.f32 1e-05, %v659_v46 }
 0x17c   : > { %v878_v33 = vadd.f32 %v2155_v28, %v828_v0  ;;  %v780_v56 = vmul.f32 %v1492_v21, %v2045_v49  ;;  %v611_v51 = vpop.xlane.xlu1 %610  ;;  %v608_v62 = vpop.xlane.xlu0 %607 }
 0x17d   : > { %922 = vst.msk [vmem:[%s2161_s6 + $0xd0] sm:$0xff] %vm235_vm0, %v879_v45  ;;  %v831_v13 = vmul.f32 %v2149_v42, %v781_v8  ;;  %1505 = vrsqrt.f32 %v703_v59  ;;  %v662_v26 = vmul.f32 0.020833334, %v611_v51  ;;  %v661_v5 = vmul.f32 0.020833334, %v608_v62 }
 0x17e   : > { %v1494_v48 = vpop.eup %1493  ;;  %921 = vst.msk [vmem:[%s2161_s6 + $0xc8] sm:$0xff] %vm235_vm0, %v878_v33  ;;  %v830_v43 = vmul.f32 %v2149_v42, %v780_v56  ;;  %1507 = vrsqrt.f32 %v702_v14 }
 0x17f   : > { %v1496_v20 = vpop.eup %1495  ;;  %v881_v49 = vadd.f32 %v2155_v28, %v831_v13  ;;  %v783_v10 = vmul.f32 %v1494_v48, %v2066_v63  ;;  %v705_v6 = vadd.f32 1e-05, %v662_v26  ;;  %v704_v40 = vadd.f32 1e-05, %v661_v5 }
 0x180   : > { %v880_v23 = vadd.f32 %v2155_v28, %v830_v43  ;;  %v782_v25 = vmul.f32 %v1496_v20, %v2057_v53  ;;  %v617_v37 = vpop.xlane.xlu1 %616  ;;  %v614_v12 = vpop.xlane.xlu0 %613 }
 0x181   : > { %924 = vst.msk [vmem:[%s2161_s6 + $0xe0] sm:$0xff] %vm235_vm0, %v881_v49  ;;  %v833_v60 = vmul.f32 %v2149_v42, %v783_v10  ;;  %1509 = vrsqrt.f32 %v705_v6  ;;  %v664_v35 = vmul.f32 0.020833334, %v617_v37  ;;  %v663_v54 = vmul.f32 0.020833334, %v614_v12 }
 0x182   : > { %v1498_v32 = vpop.eup %1497  ;;  %923 = vst.msk [vmem:[%s2161_s6 + $0xd8] sm:$0xff] %vm235_vm0, %v880_v23  ;;  %v832_v63 = vmul.f32 %v2149_v42, %v782_v25  ;;  %1511 = vrsqrt.f32 %v704_v40 }
 0x183   : > { %v1500_v1 = vpop.eup %1499  ;;  %v883_v53 = vadd.f32 %v2155_v28, %v833_v60  ;;  %v785_v2 = vmul.f32 %v1498_v32, %v2078_v31  ;;  %v707_v17 = vadd.f32 1e-05, %v664_v35  ;;  %v706_v39 = vadd.f32 1e-05, %v663_v54 }
 0x184   : > { %v882_v30 = vadd.f32 %v2155_v28, %v832_v63  ;;  %v784_v15 = vmul.f32 %v1500_v1, %v2069_v57  ;;  %v623_v50 = vpop.xlane.xlu1 %622  ;;  %v620_v38 = vpop.xlane.xlu0 %619 }
 0x185   : > { %926 = vst.msk [vmem:[%s2161_s6 + $0xf0] sm:$0xff] %vm235_vm0, %v883_v53  ;;  %v835_v41 = vmul.f32 %v2149_v42, %v785_v2  ;;  %1513 = vrsqrt.f32 %v707_v17  ;;  %v666_v9 = vmul.f32 0.020833334, %v623_v50  ;;  %v665_v29 = vmul.f32 0.020833334, %v620_v38 }
 0x186   : > { %v1502_v52 = vpop.eup %1501  ;;  %925 = vst.msk [vmem:[%s2161_s6 + $0xe8] sm:$0xff] %vm235_vm0, %v882_v30  ;;  %v834_v31 = vmul.f32 %v2149_v42, %v784_v15  ;;  %1515 = vrsqrt.f32 %v706_v39 }
 0x187   : > { %v1504_v24 = vpop.eup %1503  ;;  %v885_v57 = vadd.f32 %v2155_v28, %v835_v41  ;;  %v787_v18 = vmul.f32 %v1502_v52, %v2090_v58  ;;  %v709_v44 = vadd.f32 1e-05, %v666_v9  ;;  %v708_v16 = vadd.f32 1e-05, %v665_v29 }
 0x188   : > { %v884_v3 = vadd.f32 %v2155_v28, %v834_v31  ;;  %v786_v36 = vmul.f32 %v1504_v24, %v2081_v61 }
 0x189   : > { %928 = vst.msk [vmem:[%s2161_s6 + $0x100] sm:$0xff] %vm235_vm0, %v885_v57  ;;  %v837_v46 = vmul.f32 %v2149_v42, %v787_v18  ;;  %1517 = vrsqrt.f32 %v709_v44 }
 0x18a   : > { %v1506_v55 = vpop.eup %1505  ;;  %927 = vst.msk [vmem:[%s2161_s6 + $0xf8] sm:$0xff] %vm235_vm0, %v884_v3  ;;  %v836_v0 = vmul.f32 %v2149_v42, %v786_v36  ;;  %1519 = vrsqrt.f32 %v708_v16 }
 0x18b   : > { %v1508_v58 = vpop.eup %1507  ;;  %v887_v21 = vadd.f32 %v2155_v28, %v837_v46  ;;  %v789_v45 = vmul.f32 %v1506_v55, %v2102_v22 }
 0x18c   : > { %v886_v61 = vadd.f32 %v2155_v28, %v836_v0  ;;  %v788_v8 = vmul.f32 %v1508_v58, %v2093_v4 }
 0x18d   : > { %930 = vst.msk [vmem:[%s2161_s6 + $0x110] sm:$0xff] %vm235_vm0, %v887_v21  ;;  %v839_v59 = vmul.f32 %v2149_v42, %v789_v45 }
 0x18e   : > { %v1510_v14 = vpop.eup %1509  ;;  %929 = vst.msk [vmem:[%s2161_s6 + $0x108] sm:$0xff] %vm235_vm0, %v886_v61  ;;  %v838_v33 = vmul.f32 %v2149_v42, %v788_v8 }
 0x18f   : > { %v1512_v56 = vpop.eup %1511  ;;  %v889_v51 = vadd.f32 %v2155_v28, %v839_v59  ;;  %v791_v22 = vmul.f32 %v1510_v14, %v2114_v47 }
 0x190   : > { %v888_v62 = vadd.f32 %v2155_v28, %v838_v33  ;;  %v790_v4 = vmul.f32 %v1512_v56, %v2105_v11 }
 0x191   : > { %932 = vst.msk [vmem:[%s2161_s6 + $0x120] sm:$0xff] %vm235_vm0, %v889_v51  ;;  %v841_v13 = vmul.f32 %v2149_v42, %v791_v22 }
 0x192   : > { %v1514_v26 = vpop.eup %1513  ;;  %931 = vst.msk [vmem:[%s2161_s6 + $0x118] sm:$0xff] %vm235_vm0, %v888_v62  ;;  %v840_v5 = vmul.f32 %v2149_v42, %v790_v4 }
 0x193   : > { %v1516_v48 = vpop.eup %1515  ;;  %v891_v43 = vadd.f32 %v2155_v28, %v841_v13  ;;  %v793_v47 = vmul.f32 %v1514_v26, %v2126_v7 }
 0x194   : > { %v890_v20 = vadd.f32 %v2155_v28, %v840_v5  ;;  %v792_v11 = vmul.f32 %v1516_v48, %v2117_v19 }
 0x195   : > { %934 = vst.msk [vmem:[%s2161_s6 + $0x130] sm:$0xff] %vm235_vm0, %v891_v43  ;;  %v843_v49 = vmul.f32 %v2149_v42, %v793_v47 }
 0x196   : > { %v1518_v10 = vpop.eup %1517  ;;  %933 = vst.msk [vmem:[%s2161_s6 + $0x128] sm:$0xff] %vm235_vm0, %v890_v20  ;;  %v842_v6 = vmul.f32 %v2149_v42, %v792_v11 }
 0x197   : > { %v1520_v40 = vpop.eup %1519  ;;  %v893_v23 = vadd.f32 %v2155_v28, %v843_v49  ;;  %v795_v7 = vmul.f32 %v1518_v10, %v2138_v34 }
 0x198   : > { %v892_v25 = vadd.f32 %v2155_v28, %v842_v6  ;;  %v794_v19 = vmul.f32 %v1520_v40, %v2129_v27 }
 0x199   : > { %936 = vst.msk [vmem:[%s2161_s6 + $0x140] sm:$0xff] %vm235_vm0, %v893_v23  ;;  %v845_v37 = vmul.f32 %v2149_v42, %v795_v7 }
 0x19a   : > { %935 = vst.msk [vmem:[%s2161_s6 + $0x138] sm:$0xff] %vm235_vm0, %v892_v25  ;;  %v844_v12 = vmul.f32 %v2149_v42, %v794_v19  ;;  %945 = sbr.rel (!%p1658_p4) target bundleno = 483 (0x1e3), region = 36 }
 0x19b   : > { %v895_v60 = vadd.f32 %v2155_v28, %v845_v37 }
 0x19c   : > { %v894_v35 = vadd.f32 %v2155_v28, %v844_v12 }
 0x19d   : > { %938 = vst.msk [vmem:[%s2161_s6 + $0x150] sm:$0xff] %vm235_vm0, %v895_v60 }
 0x19e   : > { %937 = vst.msk [vmem:[%s2161_s6 + $0x148] sm:$0xff] %vm235_vm0, %v894_v35 }
 0x19f   : > { %s2546_s7 = smov (!%p948_p8, %s947_s7), 43 }
 0x1a0   : > { %s1332_s12 = sshll.u32 %s2546_s7, 7 }
 0x1a1   : > { %p1335_p9 = scmp.eq.s32.totalorder %s1332_s12, 0 }
 0x1a2   : > { %1521 = sdivrem.u32 (!%p1335_p9), %s2546_s7, 43 }
 0x1a3   : > { %956 = sbr.rel (%p1335_p9) target bundleno = 483 (0x1e3), region = 40 }
 0x1ab   : > { %s2386_s14 = spop.drf %1521 }
 0x1ac   : > { %p1336_p10 = scmp.le.s32.totalorder %s2386_s14, 0 }
 0x1ad   : > { %s2537_s15 = smov (!%p1336_p10), %s2380_s11  ;;  %s2538_s17 = smov (!%p1336_p10), %s2161_s6 }
 0x1ae   : > { %1281 = sbr.rel (%p1336_p10) target bundleno = 458 (0x1ca), region = 116  ;;  %s2395_s18 = smov (!%p1336_p10), 0  }
 0x1af   : > { %s2397_s20 = smov (!%p1336_p10), 0  }
 0x1b3 LB: >> { %v1105_v27 = vld [vmem:[%s1587_s17] sm:$0xff]  ;;  %v1107_v34 = vld [vmem:[%s1587_s17 + $0x8] sm:$0xff]  ;;  %v1109_v42 = vld [vmem:[%s1587_s17 + $0x10] sm:$0xff]  ;;  %s1191_s21 = sadd.s32 1, %s1591_s18  ;;  %s1099_s20 = sadd.s32 1, %s1595_s20   ;;  %s1595_s20 = sphi %s2397_s20, %s1099_s20   ;;  %s1591_s18 = sphi %s2395_s18, %s2541_s18   ;;  %s1587_s17 = sphi %s2538_s17, %s2540_s17   ;;  %s1583_s15 = sphi %s2537_s15, %s2539_s15  }
 0x1b4   : >> { %1106 = vst [vmem:[%s1583_s15] sm:$0xff] %v1105_v27  ;;  %1108 = vst [vmem:[%s1583_s15 + $0x8] sm:$0xff] %v1107_v34  ;;  %v1111_v28 = vld [vmem:[%s1587_s17 + $0x18] sm:$0xff]  ;;  %v1113_v54 = vld [vmem:[%s1587_s17 + $0x20] sm:$0xff]  ;;  %p1192_p11 = scmp.ge.s32.totalorder %s1191_s21, %s2386_s14  ;;  %p1098_p12 = scmp.ge.s32.totalorder %s1099_s20, %s2386_s14 }
 0x1b5   : >> { %1110 = vst [vmem:[%s1583_s15 + $0x10] sm:$0xff] %v1109_v42  ;;  %v1115_v32 = vld [vmem:[%s1587_s17 + $0x28] sm:$0xff]  ;;  %1112 = vst [vmem:[%s1583_s15 + $0x18] sm:$0xff] %v1111_v28  ;;  %v1117_v63 = vld [vmem:[%s1587_s17 + $0x30] sm:$0xff] }
 0x1b6   : >> { %1114 = vst [vmem:[%s1583_s15 + $0x20] sm:$0xff] %v1113_v54  ;;  %1116 = vst [vmem:[%s1583_s15 + $0x28] sm:$0xff] %v1115_v32  ;;  %v1119_v1 = vld [vmem:[%s1587_s17 + $0x38] sm:$0xff]  ;;  %v1121_v53 = vld [vmem:[%s1587_s17 + $0x40] sm:$0xff]  ;;  %s2548_s21 = smov (%p1192_p11, %s1191_s21), 0 }
 0x1b7   : >> { %1118 = vst [vmem:[%s1583_s15 + $0x30] sm:$0xff] %v1117_v63  ;;  %1120 = vst [vmem:[%s1583_s15 + $0x38] sm:$0xff] %v1119_v1  ;;  %v1123_v2 = vld [vmem:[%s1587_s17 + $0x48] sm:$0xff]  ;;  %v1125_v17 = vld [vmem:[%s1587_s17 + $0x50] sm:$0xff]  ;;  %s1194_s22 = smul.u32 344, %s2548_s21  ;;  %s2541_s18 = smov %s2548_s21 }
 0x1b8   : >> { %1122 = vst [vmem:[%s1583_s15 + $0x40] sm:$0xff] %v1121_v53  ;;  %v1127_v39 = vld [vmem:[%s1587_s17 + $0x58] sm:$0xff]  ;;  %1124 = vst [vmem:[%s1583_s15 + $0x48] sm:$0xff] %v1123_v2  ;;  %v1129_v30 = vld [vmem:[%s1587_s17 + $0x60] sm:$0xff] }
 0x1b9   : >> { %1126 = vst [vmem:[%s1583_s15 + $0x50] sm:$0xff] %v1125_v17  ;;  %1128 = vst [vmem:[%s1583_s15 + $0x58] sm:$0xff] %v1127_v39  ;;  %v1131_v15 = vld [vmem:[%s1587_s17 + $0x68] sm:$0xff]  ;;  %v1133_v50 = vld [vmem:[%s1587_s17 + $0x70] sm:$0xff]  ;;  %s2459_s23 = scalar_lea.vmem %s2161_s6, %s1194_s22 [#allocation2]   ;;  %s2462_s24 = scalar_lea.vmem %s2380_s11, %s1194_s22  }
 0x1ba   : >> { %1130 = vst [vmem:[%s1583_s15 + $0x60] sm:$0xff] %v1129_v30  ;;  %1132 = vst [vmem:[%s1583_s15 + $0x68] sm:$0xff] %v1131_v15  ;;  %v1135_v38 = vld [vmem:[%s1587_s17 + $0x78] sm:$0xff]  ;;  %v1137_v41 = vld [vmem:[%s1587_s17 + $0x80] sm:$0xff] }
 0x1bb   : >> { %1134 = vst [vmem:[%s1583_s15 + $0x70] sm:$0xff] %v1133_v50  ;;  %v1139_v9 = vld [vmem:[%s1587_s17 + $0x88] sm:$0xff]  ;;  %1136 = vst [vmem:[%s1583_s15 + $0x78] sm:$0xff] %v1135_v38  ;;  %v1141_v29 = vld [vmem:[%s1587_s17 + $0x90] sm:$0xff] }
 0x1bc   : >> { %1138 = vst [vmem:[%s1583_s15 + $0x80] sm:$0xff] %v1137_v41  ;;  %1140 = vst [vmem:[%s1583_s15 + $0x88] sm:$0xff] %v1139_v9  ;;  %v1143_v52 = vld [vmem:[%s1587_s17 + $0x98] sm:$0xff]  ;;  %v1145_v31 = vld [vmem:[%s1587_s17 + $0xa0] sm:$0xff] }
 0x1bd   : >> { %1142 = vst [vmem:[%s1583_s15 + $0x90] sm:$0xff] %v1141_v29  ;;  %1144 = vst [vmem:[%s1583_s15 + $0x98] sm:$0xff] %v1143_v52  ;;  %v1147_v24 = vld [vmem:[%s1587_s17 + $0xa8] sm:$0xff]  ;;  %v1149_v57 = vld [vmem:[%s1587_s17 + $0xb0] sm:$0xff] }
 0x1be   : >> { %1146 = vst [vmem:[%s1583_s15 + $0xa0] sm:$0xff] %v1145_v31  ;;  %v1151_v18 = vld [vmem:[%s1587_s17 + $0xb8] sm:$0xff]  ;;  %1148 = vst [vmem:[%s1583_s15 + $0xa8] sm:$0xff] %v1147_v24  ;;  %v1153_v44 = vld [vmem:[%s1587_s17 + $0xc0] sm:$0xff] }
 0x1bf   : >> { %1150 = vst [vmem:[%s1583_s15 + $0xb0] sm:$0xff] %v1149_v57  ;;  %1152 = vst [vmem:[%s1583_s15 + $0xb8] sm:$0xff] %v1151_v18  ;;  %v1155_v16 = vld [vmem:[%s1587_s17 + $0xc8] sm:$0xff]  ;;  %v1157_v3 = vld [vmem:[%s1587_s17 + $0xd0] sm:$0xff] }
 0x1c0   : >> { %1154 = vst [vmem:[%s1583_s15 + $0xc0] sm:$0xff] %v1153_v44  ;;  %1156 = vst [vmem:[%s1583_s15 + $0xc8] sm:$0xff] %v1155_v16  ;;  %v1159_v36 = vld [vmem:[%s1587_s17 + $0xd8] sm:$0xff]  ;;  %v1161_v46 = vld [vmem:[%s1587_s17 + $0xe0] sm:$0xff] }
 0x1c1   : >> { %1158 = vst [vmem:[%s1583_s15 + $0xd0] sm:$0xff] %v1157_v3  ;;  %v1163_v55 = vld [vmem:[%s1587_s17 + $0xe8] sm:$0xff]  ;;  %1160 = vst [vmem:[%s1583_s15 + $0xd8] sm:$0xff] %v1159_v36  ;;  %v1165_v0 = vld [vmem:[%s1587_s17 + $0xf0] sm:$0xff] }
 0x1c2   : >> { %1162 = vst [vmem:[%s1583_s15 + $0xe0] sm:$0xff] %v1161_v46  ;;  %1164 = vst [vmem:[%s1583_s15 + $0xe8] sm:$0xff] %v1163_v55  ;;  %v1167_v58 = vld [vmem:[%s1587_s17 + $0xf8] sm:$0xff]  ;;  %v1169_v21 = vld [vmem:[%s1587_s17 + $0x100] sm:$0xff] }
 0x1c3   : >> { %1166 = vst [vmem:[%s1583_s15 + $0xf0] sm:$0xff] %v1165_v0  ;;  %1168 = vst [vmem:[%s1583_s15 + $0xf8] sm:$0xff] %v1167_v58  ;;  %v1171_v45 = vld [vmem:[%s1587_s17 + $0x108] sm:$0xff]  ;;  %v1173_v61 = vld [vmem:[%s1587_s17 + $0x110] sm:$0xff] }
 0x1c4   : >> { %1170 = vst [vmem:[%s1583_s15 + $0x100] sm:$0xff] %v1169_v21  ;;  %v1175_v8 = vld [vmem:[%s1587_s17 + $0x118] sm:$0xff]  ;;  %1172 = vst [vmem:[%s1583_s15 + $0x108] sm:$0xff] %v1171_v45  ;;  %v1177_v59 = vld [vmem:[%s1587_s17 + $0x120] sm:$0xff] }
 0x1c5   : >> { %1174 = vst [vmem:[%s1583_s15 + $0x110] sm:$0xff] %v1173_v61  ;;  %1176 = vst [vmem:[%s1583_s15 + $0x118] sm:$0xff] %v1175_v8  ;;  %v1179_v14 = vld [vmem:[%s1587_s17 + $0x128] sm:$0xff]  ;;  %v1181_v33 = vld [vmem:[%s1587_s17 + $0x130] sm:$0xff]  ;;  %1101 = sbr.rel (!%p1098_p12) target bundleno = 435 (0x1b3), region = 122 }
 0x1c6   : >> { %1178 = vst [vmem:[%s1583_s15 + $0x120] sm:$0xff] %v1177_v59  ;;  %1180 = vst [vmem:[%s1583_s15 + $0x128] sm:$0xff] %v1179_v14  ;;  %v1183_v56 = vld [vmem:[%s1587_s17 + $0x138] sm:$0xff]  ;;  %v1185_v51 = vld [vmem:[%s1587_s17 + $0x140] sm:$0xff] }
 0x1c7   : >> { %1182 = vst [vmem:[%s1583_s15 + $0x130] sm:$0xff] %v1181_v33  ;;  %v1187_v22 = vld [vmem:[%s1587_s17 + $0x148] sm:$0xff]  ;;  %1184 = vst [vmem:[%s1583_s15 + $0x138] sm:$0xff] %v1183_v56  ;;  %v1189_v62 = vld [vmem:[%s1587_s17 + $0x150] sm:$0xff]  ;;  %s2540_s17 = smov %s2459_s23 }
 0x1c8   : >> { %1186 = vst [vmem:[%s1583_s15 + $0x140] sm:$0xff] %v1185_v51  ;;  %1188 = vst [vmem:[%s1583_s15 + $0x148] sm:$0xff] %v1187_v22 }
 0x1c9   : >> { %1190 = vst [vmem:[%s1583_s15 + $0x150] sm:$0xff] %v1189_v62  ;;  %s2539_s15 = smov %s2462_s24 }
 0x1ca PF: > { %1523 = sdivrem.u32 %s2546_s7, 43 }
 0x1cb   : > { %s1337_s25 = smul.u32 344, %s2386_s14 }
 0x1cd   : > { %s1202_s26 = scalar_lea.vmem %s2161_s6, %s1337_s25 [#allocation2]   ;;  %s1204_s27 = scalar_lea.vmem %s2380_s11, %s1337_s25  }
 0x1d3   : > { %s1524_s28 = spop.drf %1523 }
 0x1d4   : > { %p1339_p13 = scmp.le.s32.totalorder %s1524_s28, 0 }
 0x1d5   : > { %s1597_s29 = smov (!%p1339_p13), %s1204_s27   ;;  %s1601_s30 = smov (!%p1339_p13), %s1202_s26  }
 0x1d6   : > { %1295 = sbr.rel (%p1339_p13) target bundleno = 483 (0x1e3), region = 127  ;;  %s1605_s4 = smov (!%p1339_p13), 0  }
 0x1d7   : > { %s1609_s5 = smov (!%p1339_p13), 0  }
 0x1db LB: >> { %v1214_v4 = vld [vmem:[%s1603_s30] sm:$0xff]  ;;  %s1216_s8 = sadd.s32 1, %s1607_s4  ;;  %s1208_s5 = sadd.s32 1, %s1611_s5   ;;  %s1611_s5 = sphi %s1609_s5, %s1208_s5   ;;  %s1607_s4 = sphi %s1605_s4, %s1606_s4   ;;  %s1603_s30 = sphi %s1601_s30, %s1221_s30   ;;  %s1599_s29 = sphi %s1597_s29, %s1222_s29  }
 0x1dc   : >> { %1215 = vst [vmem:[%s1599_s29] sm:$0xff] %v1214_v4  ;;  %p1217_p0 = scmp.ge.s32.totalorder %s1216_s8, %s1524_s28  ;;  %p1207_p1 = scmp.ge.s32.totalorder %s1208_s5, %s1524_s28 }
 0x1de   : >> { %s2550_s8 = smov (%p1217_p0, %s1216_s8), 0  ;;  %1210 = sbr.rel (!%p1207_p1) target bundleno = 475 (0x1db), region = 133 }
 0x1df   : >> { %s1340_s6 = sshll.u32 %s2550_s8, 3  ;;  %s1606_s4 = smov %s2550_s8  }
 0x1e0   : >> { %s1221_s30 = scalar_lea.vmem %s1202_s26, %s1340_s6 [#allocation2]   ;;  %s1222_s29 = scalar_lea.vmem %s1204_s27, %s1340_s6  }
 0x1e3 PF: > { %p10_p2 = scmp.ge.s32.totalorder %s1648_s16, 4   ;;  %s2542_s12 = smov %s1575_s13 }
 0x1e4   : > { %s2543_s13 = smov %s1656_s19  ;;  %s2544_s14 = smov %s1648_s16 }
 0x1e5   :  { %12 = sbr.rel (!%p10_p2) target bundleno = 2 (0x2), region = 144 }

</bundles_post_ra>
